<compile_context>
chip_gen: v7x
topology: tpu7x:2x2x1
jax: 0.10.0
libtpu: 0.0.40
codegen_flags: <defaults>
</compile_context>

<pallas_src>
import functools

import jax
import jax.numpy as jnp
from jax.experimental import pallas as pl
from jax.experimental.pallas import tpu as pltpu


# ---------------------------------------------------------------------------
# Fused kernel: pool + excitation + rescale in a single pass over the slab.
# ---------------------------------------------------------------------------
def _se_fused_kernel(x_ref, w1_ref, b1_ref, w2_ref, b2_ref, o_ref, *, inv_s):
    # x_ref/o_ref: (TB, C, S); w1: (C, Hd); b1: (1, Hd); w2: (Hd, C); b2: (1, C)
    y = jnp.sum(x_ref[...].astype(jnp.float32), axis=-1) * inv_s        # (TB, C)
    h = jnp.dot(y, w1_ref[...].astype(jnp.float32),
                preferred_element_type=jnp.float32) + b1_ref[...]
    h = jnp.maximum(h, 0.0)
    g = jnp.dot(h, w2_ref[...].astype(jnp.float32),
                preferred_element_type=jnp.float32) + b2_ref[...]
    g = jax.nn.sigmoid(g)                                               # (TB, C) f32
    # Re-read the slab from VMEM (streams through the VPU; avoids pinning it
    # in vregs across the excitation math), multiply in f32, cast once.
    o_ref[...] = (x_ref[...] * g[:, :, None]).astype(o_ref.dtype)


# ---------------------------------------------------------------------------
# Split path, kernel 1: S-chunked global-average pool + excitation -> gates.
# ---------------------------------------------------------------------------
def _se_pool_kernel(x_ref, w1_ref, b1_ref, w2_ref, b2_ref, g_ref, acc_ref, *,
                    inv_s, s_total, ts, ragged):
    # x_ref: (1, C, TS);  g_ref: (1, C, 1) f32;  acc_ref: (1, C) f32 scratch
    s = pl.program_id(1)

    @pl.when(s == 0)
    def _():
        acc_ref[...] = jnp.zeros_like(acc_ref)

    x = x_ref[...].astype(jnp.float32)
    if ragged:  # mask lanes past the true spatial extent (stale VMEM reads)
        lane = jax.lax.broadcasted_iota(jnp.int32, x.shape, 2)
        x = jnp.where(s * ts + lane < s_total, x, 0.0)
    acc_ref[...] += jnp.sum(x, axis=-1)

    @pl.when(s == pl.num_programs(1) - 1)
    def _():
        y = acc_ref[...] * inv_s                                        # (1, C)
        h = jnp.dot(y, w1_ref[...].astype(jnp.float32),
                    preferred_element_type=jnp.float32) + b1_ref[...]
        h = jnp.maximum(h, 0.0)
        g = jnp.dot(h, w2_ref[...].astype(jnp.float32),
                    preferred_element_type=jnp.float32) + b2_ref[...]
        g_ref[...] = jax.nn.sigmoid(g)[:, :, None]                      # (1, C, 1)


# ---------------------------------------------------------------------------
# Split path, kernel 2: channel-wise rescale, tiled over (B, S-chunks).
# ---------------------------------------------------------------------------
def _se_scale_kernel(x_ref, g_ref, o_ref):
    # x_ref: (1, C, TS); g_ref: (1, C, 1) f32; o_ref: (1, C, TS)
    o_ref[...] = (x_ref[...] * g_ref[...]).astype(o_ref.dtype)


def se_block(x, w1, b1, w2, b2, *, force_split=False):
    """x: (B, C, D, H, W). Weights are (in, out): w1 (C, C//r), w2 (C//r, C)."""
    B, C, D, H, W = x.shape
    S = D * H * W
    hid = w1.shape[1]
    itemsize = jnp.dtype(x.dtype).itemsize

    x_flat = x.reshape(B, C, S)                 # free view — no pad, no copy
    inv_s = float(1.0 / S)
    row_bytes = C * S * itemsize
    param_bytes = sum(int(a.size) * jnp.dtype(a.dtype).itemsize
                      for a in (w1, b1, w2, b2))
    headroom = 4 << 20

    # Physical VMEM of this generation (64 MiB/TC on v7x, 128 MiB v5e/v6e).
    try:
        phys_vmem = int(pltpu.get_tpu_info().vmem_capacity_bytes)
    except Exception:
        phys_vmem = 64 << 20                    # conservative (v7x) fallback
    if phys_vmem <= 0:
        phys_vmem = 64 << 20
    # Scoped-VMEM cap with headroom for compiler scratch: ~40 MiB on v7x,
    # ~80 MiB on v5e/v6e.
    vmem_cap = min(int(phys_vmem * 0.625), 96 << 20)
    # Per-step slab target: modest on v7x, larger where VMEM is plentiful.
    slab_cap = (8 << 20) if phys_vmem <= (64 << 20) else (16 << 20)
    # Budget for one in+out block pair, double-buffered.
    block_budget = max(0, (vmem_cap - 2 * param_bytes - headroom) // 4)

    use_split = (force_split
                 or row_bytes > block_budget               # one row won't fit
                 or (B < 4 and row_bytes >= (4 << 20)))    # tiny batch, big rows

    out_shape = jax.ShapeDtypeStruct((B, C, S), x.dtype)

    if not use_split:
        # ---------------- fused single-pass path ----------------
        per_block = min(block_budget, slab_cap)
        TB = max(1, min(B, per_block // row_bytes))
        TB = min(TB, max(1, B // 4))           # >= 4 grid steps when B >= 4
        nb = pl.cdiv(B, TB)                    # ragged batch: OOB writes dropped
        block_bytes = TB * row_bytes
        # Size the limit to the tile (never clamp below the true footprint).
        vmem_limit = int(min(max(4 * block_bytes + 2 * param_bytes + headroom,
                                 16 << 20), vmem_cap))

        out_flat = pl.pallas_call(
            functools.partial(_se_fused_kernel, inv_s=inv_s),
            out_shape=out_shape,
            grid=(nb,),
            in_specs=[
                pl.BlockSpec((TB, C, S), lambda b: (b, 0, 0)),
                pl.BlockSpec((C, hid), lambda b: (0, 0)),
                pl.BlockSpec((1, hid), lambda b: (0, 0)),
                pl.BlockSpec((hid, C), lambda b: (0, 0)),
                pl.BlockSpec((1, C), lambda b: (0, 0)),
            ],
            out_specs=pl.BlockSpec((TB, C, S), lambda b: (b, 0, 0)),
            compiler_params=pltpu.CompilerParams(
                dimension_semantics=("parallel",),
                vmem_limit_bytes=vmem_limit,
            ),
        )(x_flat, w1, b1, w2, b2)
        return out_flat.reshape(B, C, D, H, W)

    # ---------------- split path: pool+excite, then rescale ----------------
    # Spatial chunk: multiple of 128 lanes, sized to the VMEM budget.
    max_ts_bytes = max(C * 128 * itemsize, min(slab_cap, block_budget))
    TS = (max_ts_bytes // max(1, C * itemsize)) // 128 * 128
    TS = max(TS, 128)
    TS = min(TS, pl.cdiv(S, 128) * 128)
    if B < 4:  # keep >= ~4 S-chunks so both TCs / the DMA pipeline stay busy
        TS = min(TS, max(128, pl.cdiv(S, 4 * 128) * 128))
    ns = pl.cdiv(S, TS)
    ragged = (S % TS) != 0
    chunk_bytes = C * TS * itemsize

    vmem_pool = int(min(max(2 * chunk_bytes + 2 * param_bytes + headroom,
                            16 << 20), vmem_cap))
    vmem_scale = int(min(max(4 * chunk_bytes + 2 * param_bytes + headroom,
                             16 << 20), vmem_cap))

    gates = pl.pallas_call(
        functools.partial(_se_pool_kernel, inv_s=inv_s, s_total=S, ts=TS,
                          ragged=ragged),
        out_shape=jax.ShapeDtypeStruct((B, C, 1), jnp.float32),
        grid=(B, ns),
        in_specs=[
            pl.BlockSpec((1, C, TS), lambda b, s: (b, 0, s)),
            pl.BlockSpec((C, hid), lambda b, s: (0, 0)),
            pl.BlockSpec((1, hid), lambda b, s: (0, 0)),
            pl.BlockSpec((hid, C), lambda b, s: (0, 0)),
            pl.BlockSpec((1, C), lambda b, s: (0, 0)),
        ],
        out_specs=pl.BlockSpec((1, C, 1), lambda b, s: (b, 0, 0)),
        scratch_shapes=[pltpu.VMEM((1, C), jnp.float32)],
        compiler_params=pltpu.CompilerParams(
            dimension_semantics=("parallel", "arbitrary"),
            vmem_limit_bytes=vmem_pool,
        ),
    )(x_flat, w1, b1, w2, b2)

    out_flat = pl.pallas_call(
        _se_scale_kernel,
        out_shape=out_shape,
        grid=(B, ns),
        in_specs=[
            pl.BlockSpec((1, C, TS), lambda b, s: (b, 0, s)),
            pl.BlockSpec((1, C, 1), lambda b, s: (b, 0, 0)),
        ],
        out_specs=pl.BlockSpec((1, C, TS), lambda b, s: (b, 0, s)),
        compiler_params=pltpu.CompilerParams(
            dimension_semantics=("parallel", "parallel"),
            vmem_limit_bytes=vmem_scale,
        ),
    )(x_flat, gates)
    return out_flat.reshape(B, C, D, H, W)


if __name__ == "__main__":
    # Small shapes consistent with the module: channels=32, reduction=16.
    B, C, D, H, W = 2, 32, 8, 8, 8
    reduction = 16
    hid = C // reduction

    key = jax.random.PRNGKey(0)
    kx, k1, k2, k3, k4 = jax.random.split(key, 5)

    x = jax.random.normal(kx, (B, C, D, H, W), dtype=jnp.float32)
    # fc1: C -> C//r, fc2: C//r -> C, stored as (in, out) since the kernel
    # right-multiplies the (TB, C) pooled activations.
    w1 = jax.random.normal(k1, (C, hid), dtype=jnp.float32) * 0.1
    b1 = jax.random.normal(k2, (1, hid), dtype=jnp.float32) * 0.1
    w2 = jax.random.normal(k3, (hid, C), dtype=jnp.float32) * 0.1
    b2 = jax.random.normal(k4, (1, C), dtype=jnp.float32) * 0.1

    # Plain-JAX reference of the same forward.
    y_ref = jnp.mean(x.reshape(B, C, -1), axis=-1)
    h_ref = jnp.maximum(y_ref @ w1 + b1, 0.0)
    s_ref = jax.nn.sigmoid(h_ref @ w2 + b2)
    ref = x * s_ref.reshape(B, C, 1, 1, 1)

    # Primary fused path.
    out = se_block(x, w1, b1, w2, b2)
    jax.block_until_ready(out)
    assert out.shape == x.shape
    assert jnp.allclose(out, ref, atol=1e-5, rtol=1e-5)

    # S-chunked fallback path (used automatically for huge D*H*W); exercise it
    # here to keep it verified.
    out2 = se_block(x, w1, b1, w2, b2, force_split=True)
    jax.block_until_ready(out2)
    assert jnp.allclose(out2, ref, atol=1e-5, rtol=1e-5)

    print("KERNEL_OK")
</pallas_src>

<mosaic_0001>
module attributes {stable_mosaic.version = 11 : i64} {
  func.func @_se_fused_kernel(%arg0: i32, %arg1: memref<1x32x512xf32, #tpu.memory_space<vmem>>, %arg2: memref<32x2xf32, #tpu.memory_space<vmem>>, %arg3: memref<1x2xf32, #tpu.memory_space<vmem>>, %arg4: memref<2x32xf32, #tpu.memory_space<vmem>>, %arg5: memref<1x32xf32, #tpu.memory_space<vmem>>, %arg6: memref<1x32x512xf32, #tpu.memory_space<vmem>>) attributes {dimension_semantics = [#tpu.dimension_semantics<parallel>], iteration_bounds = array<i64: 2>, scalar_prefetch = 0 : i64, scratch_operands = 0 : i64, tpu.core_type = #tpu.core_type<tc>, window_params = [{transform_indices = @transform_0, window_bounds = array<i64: 1, 32, 512>}, {pipeline_mode = #tpu.pipeline_mode<synchronous>, transform_indices = @transform_1, window_bounds = array<i64: 32, 2>}, {pipeline_mode = #tpu.pipeline_mode<synchronous>, transform_indices = @transform_2, window_bounds = array<i64: 1, 2>}, {pipeline_mode = #tpu.pipeline_mode<synchronous>, transform_indices = @transform_3, window_bounds = array<i64: 2, 32>}, {pipeline_mode = #tpu.pipeline_mode<synchronous>, transform_indices = @transform_4, window_bounds = array<i64: 1, 32>}, {transform_indices = @transform_5, window_bounds = array<i64: 1, 32, 512>}]} {
    %c0 = arith.constant 0 : index
    %c0_0 = arith.constant 0 : index
    %c0_1 = arith.constant 0 : index
    %0 = vector.load %arg1[%c0, %c0_0, %c0_1] : memref<1x32x512xf32, #tpu.memory_space<vmem>>, vector<1x32x512xf32>
    %cst = arith.constant dense<0.000000e+00> : vector<1x32xf32>
    %1 = vector.multi_reduction <add>, %0, %cst [2] : vector<1x32x512xf32> to vector<1x32xf32>
    %cst_2 = arith.constant 0.001953125 : f32
    %2 = vector.broadcast %cst_2 : f32 to vector<1x32xf32>
    %3 = arith.mulf %1, %2 : vector<1x32xf32>
    %c0_3 = arith.constant 0 : index
    %c0_4 = arith.constant 0 : index
    %4 = vector.load %arg2[%c0_3, %c0_4] : memref<32x2xf32, #tpu.memory_space<vmem>>, vector<32x2xf32>
    %cst_5 = arith.constant dense<0.000000e+00> : vector<1x2xf32>
    %5 = tpu.matmul %3, %4, %cst_5 {dimension_numbers = #tpu.dot_dimension_numbers<[1], [0], [0], [1], [0, 0, 1, 1], [], []>} : vector<1x32xf32>, vector<32x2xf32>, vector<1x2xf32> -> vector<1x2xf32>
    %c0_6 = arith.constant 0 : index
    %c0_7 = arith.constant 0 : index
    %6 = vector.load %arg3[%c0_6, %c0_7] : memref<1x2xf32, #tpu.memory_space<vmem>>, vector<1x2xf32>
    %7 = arith.addf %5, %6 : vector<1x2xf32>
    %cst_8 = arith.constant 0.000000e+00 : f32
    %8 = vector.broadcast %cst_8 : f32 to vector<1x2xf32>
    %9 = arith.maximumf %7, %8 : vector<1x2xf32>
    %c0_9 = arith.constant 0 : index
    %c0_10 = arith.constant 0 : index
    %10 = vector.load %arg4[%c0_9, %c0_10] : memref<2x32xf32, #tpu.memory_space<vmem>>, vector<2x32xf32>
    %cst_11 = arith.constant dense<0.000000e+00> : vector<1x32xf32>
    %11 = tpu.matmul %9, %10, %cst_11 {dimension_numbers = #tpu.dot_dimension_numbers<[1], [0], [0], [1], [0, 0, 1, 1], [], []>} : vector<1x2xf32>, vector<2x32xf32>, vector<1x32xf32> -> vector<1x32xf32>
    %c0_12 = arith.constant 0 : index
    %c0_13 = arith.constant 0 : index
    %12 = vector.load %arg5[%c0_12, %c0_13] : memref<1x32xf32, #tpu.memory_space<vmem>>, vector<1x32xf32>
    %13 = arith.addf %11, %12 : vector<1x32xf32>
    %14 = arith.negf %13 : vector<1x32xf32>
    %15 = math.exp %14 : vector<1x32xf32>
    %cst_14 = arith.constant 1.000000e+00 : f32
    %16 = vector.broadcast %cst_14 : f32 to vector<1x32xf32>
    %17 = arith.addf %16, %15 : vector<1x32xf32>
    %18 = arith.divf %16, %17 : vector<1x32xf32>
    %c0_15 = arith.constant 0 : index
    %c0_16 = arith.constant 0 : index
    %c0_17 = arith.constant 0 : index
    %19 = vector.load %arg1[%c0_15, %c0_16, %c0_17] : memref<1x32x512xf32, #tpu.memory_space<vmem>>, vector<1x32x512xf32>
    %20 = vector.shape_cast %18 : vector<1x32xf32> to vector<1x32x1xf32>
    %21 = vector.broadcast %20 : vector<1x32x1xf32> to vector<1x32x512xf32>
    %22 = arith.mulf %19, %21 : vector<1x32x512xf32>
    %c0_18 = arith.constant 0 : index
    %c0_19 = arith.constant 0 : index
    %c0_20 = arith.constant 0 : index
    %23 = vector.load %arg6[%c0_18, %c0_19, %c0_20] : memref<1x32x512xf32, #tpu.memory_space<vmem>>, vector<1x32x512xf32>
    tpu.vector_store %arg6[%c0_18, %c0_19, %c0_20], %22 {strides = array<i32>} : memref<1x32x512xf32, #tpu.memory_space<vmem>>, vector<1x32x512xf32>,
    return
  }
  func.func @transform_0(%arg0: i32) -> (i32, i32, i32) {
    %c0_i32 = arith.constant 0 : i32
    %c0_i32_0 = arith.constant 0 : i32
    %c0_i32_1 = arith.constant 0 : i32
    return %arg0, %c0_i32, %c0_i32_0 : i32, i32, i32
  }
  func.func @transform_1(%arg0: i32) -> (i32, i32) {
    %c0_i32 = arith.constant 0 : i32
    %c0_i32_0 = arith.constant 0 : i32
    %c0_i32_1 = arith.constant 0 : i32
    return %c0_i32, %c0_i32_0 : i32, i32
  }
  func.func @transform_2(%arg0: i32) -> (i32, i32) {
    %c0_i32 = arith.constant 0 : i32
    %c0_i32_0 = arith.constant 0 : i32
    %c0_i32_1 = arith.constant 0 : i32
    return %c0_i32, %c0_i32_0 : i32, i32
  }
  func.func @transform_3(%arg0: i32) -> (i32, i32) {
    %c0_i32 = arith.constant 0 : i32
    %c0_i32_0 = arith.constant 0 : i32
    %c0_i32_1 = arith.constant 0 : i32
    return %c0_i32, %c0_i32_0 : i32, i32
  }
  func.func @transform_4(%arg0: i32) -> (i32, i32) {
    %c0_i32 = arith.constant 0 : i32
    %c0_i32_0 = arith.constant 0 : i32
    %c0_i32_1 = arith.constant 0 : i32
    return %c0_i32, %c0_i32_0 : i32, i32
  }
  func.func @transform_5(%arg0: i32) -> (i32, i32, i32) {
    %c0_i32 = arith.constant 0 : i32
    %c0_i32_0 = arith.constant 0 : i32
    %c0_i32_1 = arith.constant 0 : i32
    return %arg0, %c0_i32, %c0_i32_0 : i32, i32, i32
  }
}

</mosaic_0001>

<bundles_post_ra>
// kernel: tpu_custom_call.1
= control target key start
LH: loop header
LB: loop body
LE: loop exit
PB: predicated region body
PF: predicated region fallthrough
CT: control target
= control target key end

     0   :  { %10 = vsyncpa [#allocation3], 0  ;;  %s1111_s0 = inlined_call_operand.hbm [shape: f32[2,32,512], index: 0, kind: input, shape index: {}]   ;;  %s1112_s1 = inlined_call_operand.vmem [shape: f32[32,2], index: 1, kind: input, shape index: {}]   ;;  %s1113_s2 = inlined_call_operand.vmem [shape: f32[1,2], index: 2, kind: input, shape index: {}]   ;;  %s1114_s3 = inlined_call_operand.vmem [shape: f32[2,32], index: 3, kind: input, shape index: {}]   ;;  %s1115_s4 = inlined_call_operand.vmem [shape: f32[1,32], index: 4, kind: input, shape index: {}]   ;;  %s1116_s5 = inlined_call_operand.hbm [shape: f32[2,32,512], index: 5, kind: output, shape index: {}]  }
   0x1   :  { %12 = vsyncpa [#allocation3 + $0x1], 0 }
   0x2   :  { %13 = vsyncpa [#allocation4], 0 }
   0x3   :  { %15 = vsyncpa [#allocation4 + $0x1], 0  ;;  %s860_s18 = smov 0   ;;  %s862_s19 = smov 0  }
   0x4   :  { %s864_s20 = smov 0   ;;  %s866_s21 = smov 0  }
   0x5 LB: > { %s881_s22 = sadd.s32 4294967295, %s819_s21   ;;  %s617_s23 = sadd.s32 4294967294, %s819_s21   ;;  %s819_s21 = sphi %s866_s21, %s1129_s21   ;;  %s815_s20 = sphi %s864_s20, %s1128_s20   ;;  %s811_s19 = sphi %s862_s19, %s1127_s19   ;;  %s807_s18 = sphi %s860_s18, %s1126_s18  }
   0x6   : > { %s885_s24 = sadd.s32 1, %s819_s21   ;;  %s28_s25 = sadd.s32 1, %s815_s20 }
   0x7   : > { %s25_s26 = ssub.s32 %s819_s21, %s885_s24  ;;  %p35_p0 = scmp.ne.s32.totalorder %s815_s20, %s811_s19 }
   0x8   : > { %p26_p1 = scmp.eq.s32.totalorder %s25_s26, 0  ;;  %p36_p2 = scmp.eq.s32.totalorder %s819_s21, 0 }
   0x9   : > { %p41_p3 = scmp.ne.s32.totalorder %s811_s19, %s807_s18  ;;  %p42_p4 = scmp.eq.s32.totalorder %s881_s22, 0 }
   0xa   : > { %s897_s27 = scalar_select %p26_p1, %s815_s20, %s28_s25  }
   0xb   : > { %p899_p5 = por %p36_p2, %p35_p0  ;;  %p903_p6 = por %p42_p4, %p41_p3 }
   0xc   : > { %p149_p7 = scmp.eq.s32.totalorder %s881_s22, 1  ;;  %p155_p8 = scmp.eq.s32.totalorder %s617_s23, 1 }
   0xd   : > { %p678_p10 = scmp.lt.s32.totalorder %s819_s21, 2  ;;  %s187_s7 = sand.u32 1, %s815_s20  }
   0xe   : > { %p910_p11 = por %p149_p7, %p35_p0  ;;  %p914_p12 = por %p155_p8, %p41_p3 }
   0xf   : > { %s635_s8 = sshll.u32 %s819_s21, 11  ;;  %s620_s9 = sshll.u32 %s187_s7, 7 }
  0x10   : > { %s1120_s30 = scalar_select %p910_p11, 1, 0 }
  0x11   : > { %s1121_s6 = scalar_select %p914_p12, 1, 0 }
  0x12   : > { %s923_s12 = scalar_lea.hbm %s1111_s0, %s635_s8  ;;  %s191_s13 = scalar_lea.vmem [#allocation2], %s620_s9 }
  0x13   : > { %s198_s14 = sshll.u32 %s191_s13, 4  ;;  %p927_p13 = pnand %p678_p10, %p899_p5  ;;  %s931_s14 = int_to_ptr.vmem [resolvable:$true] %s198_s14 }
  0x14   : > { %s933_s16 = scalar_lea.sflag [#allocation3], %s187_s7  ;;  %s723_s17 = scalar_lea.hbm %s923_s12, 2048 }
  0x15   : > { %p724_p0 = scmp.ne.s32.totalorder %s923_s12, %s723_s17  ;;  %p725_p1 = pneg %p927_p13 }
  0x16   : > { %s728_s26 = scalar_lea.hbm %s1111_s0, 4096  ;;  %p729_p4 = scmp.lt.u32.totalorder %s923_s12, %s1111_s0 }
  0x17   : > { %p726_p2 = pnand %p725_p1, %p724_p0  ;;  %p730_p5 = scmp.lt.u32.totalorder %s728_s26, %s723_s17 }
  0x18   : > { %p732_p8 = scmp.lt.u32.totalorder %s723_s17, %s923_s12 }
  0x19   : > { %p727_p3 = pneg %p726_p2  ;;  %p731_p7 = por %p730_p5, %p729_p4 }
  0x1b   : > { %p733_p10 = por %p732_p8, %p731_p7 }
  0x1d   : > { %p734_p9 = pnand %p733_p10, %p727_p3 }
  0x1f   : > { %737 = shalt.err (!%p734_p9)
}
  0x20   : > { %s738_s7 = scalar_lea.vmem %s931_s14, 2048  ;;  %s821_s9 = smov [#allocation2]  }
  0x21   : > { %p739_p0 = scmp.ne.s32.totalorder %s931_s14, %s738_s7  ;;  %s743_s10 = sshll.u32 %s821_s9, 4  ;;  %s744_s10 = int_to_ptr.vmem [resolvable:$false] %s743_s10 }
  0x22   : > { %s745_s11 = scalar_lea.vmem %s744_s10, 4096  ;;  %p746_p11 = scmp.lt.s32.totalorder %s931_s14, %s744_s10 }
  0x23   : > { %p741_p2 = pnand %p739_p0, %p725_p1  ;;  %p747_p4 = scmp.lt.s32.totalorder %s745_s11, %s738_s7 }
  0x25   : > { %p742_p12 = pneg %p741_p2  ;;  %p748_p5 = por %p747_p4, %p746_p11 }
  0x27   : > { %p749_p7 = pnand %p748_p5, %p742_p12 }
  0x29   : > { %752 = shalt.err (!%p749_p7)
}
  0x2a   : > { %s822_s13 = smov 512   ;;  %s823_s17 = smov 32  }
  0x2b   : > { %673 = dma.hbm_to_vmem [thread:$0]  (!%p927_p13), %s923_s12, 2048, %s931_s14, %s933_s16, %s822_s13, %s822_s13, %s823_s17  }
  0x2c   : > { %p623_p9 = scmp.ge.s32.totalorder %s819_s21, 1  ;;  %p206_p1 = scmp.lt.s32.totalorder %s819_s21, 3 }
  0x2e   : > { %p207_p3 = pnand %p623_p9, %p206_p1 }
  0x2f   : > { %s964_s23 = sand.u32 (!%p207_p3), 1, %s811_s19  }
  0x30   : > { %210 = sbr.rel (%p207_p3) target bundleno = 815 (0x32f), region = 40  ;;  %s624_s25 = sshll.u32 (!%p207_p3), %s964_s23, 7 }
  0x31   : > { %s213_s26 = scalar_lea.sflag (!%p207_p3), [#allocation3], %s964_s23  ;;  %s216_s28 = scalar_lea.vmem (!%p207_p3), [#allocation2], %s624_s25 }
  0x37   : > { %798 = dma.done.wait (%p903_p6), %s213_s26, 2048  }
  0x38   : > { %800 = vsyncadd (%p903_p6), %s213_s26, 4294965248  ;;  %v974_v0 = vld [vmem:[%s216_s28] sm:$0xff]  ;;  %v976_v1 = vld [vmem:[%s216_s28 + $0x8] sm:$0xff]  ;;  %v824_v31 = vmov 0.0|0.0   ;;  %vm825_vm0 = vmmov 0   ;;  %v826_v35 = vmov 0.0   ;;  %v292_v36 = vlaneseq }
  0x39   : > { %v978_v2 = vld [vmem:[%s216_s28 + $0x10] sm:$0xff]  ;;  %v259_v3 = vadd.f32 %v976_v1, %v974_v0  ;;  %v982_v4 = vld [vmem:[%s216_s28 + $0x40] sm:$0xff]  ;;  %v984_v5 = vld [vmem:[%s216_s28 + $0x48] sm:$0xff]  ;;  %660 = vmatprep.subr.bf16.mxu0 %v824_v31  ;;  %652 = vmatprep.mubr.msk.f32.mxu0 %vm825_vm0, %v826_v35  ;;  %vm303_vm1 = vcmask 130112   ;;  %vm310_vm2 = vcmask 195712   ;;  %vm317_vm3 = vcmask 261312  }
  0x3a   : > { %v986_v6 = vld [vmem:[%s216_s28 + $0x18] sm:$0xff]  ;;  %v988_v7 = vld [vmem:[%s216_s28 + $0x50] sm:$0xff]  ;;  %v269_v8 = vadd.f32 %v984_v5, %v982_v4  ;;  %v992_v9 = vld [vmem:[%s216_s28 + $0x20] sm:$0xff]  ;;  %655 = vmatprep.subr.mxu1 %v826_v35  ;;  %657 = vmatprep.mubr.msk.f32.mxu1 %vm825_vm0, %v826_v35  ;;  %v293_v37 = vand.u32 127, %v292_v36  ;;  %v295_v38 = vshrl.u32 %v292_v36, 7  ;;  %vm319_vm4 = vcmask 261120  }
  0x3b   : > { %v260_v10 = vadd.f32 %v259_v3, %v978_v2  ;;  %v995_v11 = vld [vmem:[%s216_s28 + $0x58] sm:$0xff]  ;;  %v997_v12 = vld [vmem:[%s216_s28 + $0x28] sm:$0xff]  ;;  %v999_v13 = vld [vmem:[%s216_s28 + $0x30] sm:$0xff]  ;;  %vm399_vm5 = vcmask 1041408   ;;  %vm395_vm6 = vcmask 15360   ;;  %s242_s29 = scalar_lea.vmem [#allocation5], %s624_s25 }
  0x3c   : > { %v270_v14 = vadd.f32 %v269_v8, %v988_v7  ;;  %v264_v15 = vadd.f32 %v997_v12, %v992_v9  ;;  %v1004_v16 = vld [vmem:[%s216_s28 + $0x60] sm:$0xff]  ;;  %v1006_v17 = vld [vmem:[%s216_s28 + $0x68] sm:$0xff]  ;;  %v1008_v18 = vld [vmem:[%s216_s28 + $0x70] sm:$0xff]  ;;  %v298_v39 = vadd.s32 4294967288, %v293_v37  ;;  %v305_v41 = vadd.s32 4294967280, %v293_v37  ;;  %s636_s12 = sshll.u32 %s881_s22, 11 }
  0x3d   : > { %v261_v19 = vadd.f32 %v260_v10, %v986_v6  ;;  %v1011_v20 = vld [vmem:[%s216_s28 + $0x38] sm:$0xff]  ;;  %v274_v21 = vadd.f32 %v1006_v17, %v1004_v16  ;;  %v283_v28 = vld [vmem:[%s1112_s1] sm:$0xff]  ;;  %v284_v29 = vld [vmem:[%s1112_s1 + $0x8] sm:$0xff]  ;;  %v312_v42 = vadd.s32 4294967272, %v293_v37  ;;  %v296_v44 = vsub.s32 %v293_v37, %v295_v38  ;;  %s544_s14 = sshll.u32 %s242_s29, 4  ;;  %s1061_s16 = scalar_lea.hbm %s1116_s5, %s636_s12  ;;  %s1063_s14 = int_to_ptr.vmem [resolvable:$true] %s544_s14 }
  0x3e   : > { %v271_v22 = vadd.f32 %v270_v14, %v995_v11  ;;  %v265_v23 = vadd.f32 %v264_v15, %v999_v13  ;;  %v1017_v24 = vld [vmem:[%s216_s28 + $0x78] sm:$0xff]  ;;  %v661_v30 = vpack.c.bf16 %v284_v29, %v283_v28  ;;  %v285_v32 = vld [vmem:[%s1112_s1 + $0x10] sm:$0xff]  ;;  %v301_v46 = vsub.s32 %v298_v39, %v295_v38  ;;  %v393_v61 = vld [vmem:[%s1114_s3] sm:$0x3]  ;;  %s531_s22 = scalar_lea.sflag [#allocation4], %s964_s23  ;;  %s753_s8 = scalar_lea.vmem %s1063_s14, 2048 }
  0x3f   : > { %262 = vadd.xlane.f32.xlu0 %v261_v19  ;;  %v275_v25 = vadd.f32 %v274_v21, %v1008_v18  ;;  %v286_v33 = vld [vmem:[%s1112_s1 + $0x18] sm:$0xff]  ;;  %v308_v47 = vsub.s32 %v305_v41, %v295_v38  ;;  %v315_v50 = vsub.s32 %v312_v42, %v295_v38  ;;  %656 = vmatpush3.msk.msra.mxu1 %vm399_vm5, %v393_v61  ;;  %v287_v62 = vld [vmem:[%s1113_s2] sm:$0x1]  ;;  %p754_p6 = scmp.ne.s32.totalorder %s1063_s14, %s753_s8  ;;  %p1123_p11 = scmp.ne.s32.totalorder %s1120_s30, 0 }
  0x40   : > { %272 = vadd.xlane.f32.xlu1 %v271_v22  ;;  %v266_v26 = vadd.f32 %v265_v23, %v1011_v20  ;;  %662 = vmatpush3.bf16.msra.mxu0 %v661_v30  ;;  %v664_v34 = vpack.c.bf16 %v286_v33, %v285_v32  ;;  %v394_v14 = vld [vmem:[%s1115_s4] sm:$0x1]  ;;  %s827_s7 = smov [#allocation5]  }
  0x41   : > { %v276_v27 = vadd.f32 %v275_v25, %v1017_v24  ;;  %663 = vmatprep.subr.bf16.mxu0 %v824_v31  ;;  %p755_p12 = pnand %p754_p6, %p1123_p11  ;;  %s757_s9 = sshll.u32 %s827_s7, 4  ;;  %s758_s9 = int_to_ptr.vmem [resolvable:$false] %s757_s9 }
  0x42   : > { %s759_s10 = scalar_lea.vmem %s758_s9, 4096  ;;  %p760_p8 = scmp.lt.s32.totalorder %s1063_s14, %s758_s9 }
  0x43   : > { %267 = vadd.xlane.f32.xlu0 %v266_v26  ;;  %v481_v26 = vsub.s32 0, %v295_v38  ;;  %p756_p13 = pneg %p755_p12  ;;  %p761_p10 = scmp.lt.s32.totalorder %s759_s10, %s753_s8 }
  0x44   : > { %277 = vadd.xlane.f32.xlu1 %v276_v27  ;;  %665 = vmatpush3.bf16.msra.mxu0 %v664_v34 }
  0x45   : > { %p762_p0 = por %p761_p10, %p760_p8 }
  0x47   : > { %p763_p2 = pnand %p762_p0, %p756_p13 }
  0xcc   : > { %v263_v40 = vpop.xlane.xlu0 %262 }
  0xcd   : > { %v273_v43 = vpop.xlane.xlu1 %272  ;;  %v279_v45 = vmul.f32 0.001953125, %v263_v40 }
  0xce   : > { %v281_v48 = vmul.f32 0.001953125, %v273_v43 }
  0xcf   : > { %v297_v54 = vrot.slane %v279_v45, %v296_v44 }
  0xd0   : > { %v268_v49 = vpop.xlane.xlu0 %267  ;;  %v309_v56 = vrot.slane %v281_v48, %v308_v47 }
  0xd1   : > { %v280_v51 = vmul.f32 0.001953125, %v268_v49  ;;  %v278_v52 = vpop.xlane.xlu1 %277 }
  0xd2   : > { %v282_v53 = vmul.f32 0.001953125, %v278_v52 }
  0xd3   : > { %v302_v55 = vrot.slane %v280_v51, %v301_v46 }
  0xd4   : > { %v316_v57 = vrot.slane %v282_v53, %v315_v50 }
  0xd5   : > { %v304_v58 = vsel %vm303_vm1, %v302_v55, %v297_v54 }
  0xd6   : > { %v311_v59 = vsel %vm310_vm2, %v309_v56, %v304_v58 }
  0xd7   : > { %v318_v60 = vsel %vm317_vm3, %v316_v57, %v311_v59 }
  0xd8   : > { %653 = vmatmul.mubr.msk.f32.vlgmr.msra.gmra.mrb[0].mxu0 %vm319_vm4, %v318_v60 }
 0x1ab   : > { %v388_v63 = vpop.f32.mrb[0].mxu0 }
 0x1ac   : > { %v389_v3 = vadd.f32 %v388_v63, %v287_v62  ;;  %v654_v8 = vpop.f32.mrb[1].mxu0 }
 0x1ae   : > { %v392_v10 = vmax.f32 %v389_v3, 0.0 }
 0x1b0   : > { %658 = vmatmul.mubr.msk.f32.vlgmr.msra.gmra.mrb[0].mxu1 %vm395_vm6, %v392_v10 }
 0x283   : > { %v469_v15 = vpop.f32.mrb[0].mxu1 }
 0x284   : > { %v470_v19 = vadd.f32 %v469_v15, %v394_v14  ;;  %v659_v21 = vpop.f32.mrb[1].mxu1 }
 0x286   : > { %v629_v22 = vmul.f32 -1.442695, %v470_v19 }
 0x288   : > { %719 = vpow2.f32 %v629_v22 }
 0x292   : > { %v720_v23 = vpop.eup %719 }
 0x293   : > { %v476_v25 = vadd.f32 1.0, %v720_v23 }
 0x295   : > { %721 = vrcp.f32 %v476_v25 }
 0x29f   : > { %v722_v27 = vpop.eup %721 }
 0x2a0   : > { %v482_v28 = vrot.slane %v722_v27, %v481_v26 }
 0x2a2   : > { %488 = vbcast.lane.b32.xlu1 %v482_v28, 264  ;;  %484 = vbcast.lane.b32.xlu0 %v482_v28, 256 }
 0x2a6   : > { %492 = vbcast.lane.b32.xlu1 %v482_v28, 272 }
 0x2aa   : > { %496 = vbcast.lane.b32.xlu1 %v482_v28, 280 }
 0x314   : > { %v489_v29 = vpop.permute.xlu1 %488  ;;  %v485_v30 = vpop.permute.xlu0 %484 }
 0x315   : > { %v502_v31 = vmul.f32 %v489_v29, %v992_v9  ;;  %v503_v32 = vmul.f32 %v489_v29, %v997_v12  ;;  %v504_v33 = vmul.f32 %v489_v29, %v999_v13  ;;  %v505_v34 = vmul.f32 %v489_v29, %v1011_v20 }
 0x316   : > { %v498_v35 = vmul.f32 %v485_v30, %v974_v0  ;;  %v499_v36 = vmul.f32 %v485_v30, %v976_v1  ;;  %v500_v37 = vmul.f32 %v485_v30, %v978_v2  ;;  %v501_v38 = vmul.f32 %v485_v30, %v986_v6 }
 0x317   : > { %518 = vst [vmem:[%s242_s29 + $0x20] sm:$0xff] %v502_v31  ;;  %519 = vst [vmem:[%s242_s29 + $0x28] sm:$0xff] %v503_v32 }
 0x318   : > { %520 = vst [vmem:[%s242_s29 + $0x30] sm:$0xff] %v504_v33  ;;  %521 = vst [vmem:[%s242_s29 + $0x38] sm:$0xff] %v505_v34  ;;  %v493_v9 = vpop.permute.xlu1 %492 }
 0x319   : > { %514 = vst [vmem:[%s242_s29] sm:$0xff] %v498_v35  ;;  %515 = vst [vmem:[%s242_s29 + $0x8] sm:$0xff] %v499_v36  ;;  %v506_v0 = vmul.f32 %v493_v9, %v982_v4  ;;  %v507_v1 = vmul.f32 %v493_v9, %v984_v5  ;;  %v508_v2 = vmul.f32 %v493_v9, %v988_v7 }
 0x31a   : > { %516 = vst [vmem:[%s242_s29 + $0x10] sm:$0xff] %v500_v37  ;;  %517 = vst [vmem:[%s242_s29 + $0x18] sm:$0xff] %v501_v38  ;;  %v509_v12 = vmul.f32 %v493_v9, %v995_v11 }
 0x31b   : > { %522 = vst [vmem:[%s242_s29 + $0x40] sm:$0xff] %v506_v0  ;;  %523 = vst [vmem:[%s242_s29 + $0x48] sm:$0xff] %v507_v1 }
 0x31c   : > { %524 = vst [vmem:[%s242_s29 + $0x50] sm:$0xff] %v508_v2  ;;  %525 = vst [vmem:[%s242_s29 + $0x58] sm:$0xff] %v509_v12  ;;  %v497_v6 = vpop.permute.xlu1 %496 }
 0x31d   : > { %v510_v4 = vmul.f32 %v497_v6, %v1004_v16  ;;  %v511_v5 = vmul.f32 %v497_v6, %v1006_v17  ;;  %v512_v7 = vmul.f32 %v497_v6, %v1008_v18  ;;  %v513_v11 = vmul.f32 %v497_v6, %v1017_v24 }
 0x31f   : > { %526 = vst [vmem:[%s242_s29 + $0x60] sm:$0xff] %v510_v4  ;;  %527 = vst [vmem:[%s242_s29 + $0x68] sm:$0xff] %v511_v5 }
 0x320   : > { %528 = vst [vmem:[%s242_s29 + $0x70] sm:$0xff] %v512_v7  ;;  %529 = vst [vmem:[%s242_s29 + $0x78] sm:$0xff] %v513_v11 }
 0x321   : > { %766 = shalt.err (!%p763_p2)
}
 0x322   : > { %s767_s11 = scalar_lea.hbm %s1061_s16, 2048  ;;  %s771_s26 = scalar_lea.hbm %s1116_s5, 4096 }
 0x323   : > { %p768_p4 = scmp.ne.s32.totalorder %s1061_s16, %s767_s11  ;;  %p772_p9 = scmp.lt.u32.totalorder %s1061_s16, %s1116_s5 }
 0x324   : > { %p773_p1 = scmp.lt.u32.totalorder %s771_s26, %s767_s11  ;;  %p775_p6 = scmp.lt.u32.totalorder %s767_s11, %s1061_s16 }
 0x325   : > { %p769_p5 = pnand %p768_p4, %p1123_p11 }
 0x326   : > { %p774_p3 = por %p773_p1, %p772_p9 }
 0x327   : > { %p770_p7 = pneg %p769_p5 }
 0x328   : > { %p776_p12 = por %p775_p6, %p774_p3 }
 0x32a   : > { %p777_p13 = pnand %p776_p12, %p770_p7 }
 0x32c   : > { %780 = shalt.err (!%p777_p13)
}
 0x32d   : > { %s828_s12 = smov 512   ;;  %s829_s25 = smov 32  }
 0x32e   : > { %668 = dma.vmem_to_hbm [thread:$0]  (%p1123_p11), %s1063_s14, 2048, %s1061_s16, %s531_s22, %s828_s12, %s828_s12, %s829_s25  }
 0x32f PF: > { %s559_s15 = sand.u32 1, %s807_s18   ;;  %p1124_p8 = scmp.ne.s32.totalorder %s1121_s6, 0 }
 0x330   : > { %p1125_p10 = scmp.ge.s32.totalorder %s819_s21, 2  ;;  %s560_s8 = scalar_lea.sflag [#allocation4], %s559_s15 }
 0x332   : > { %p675_p0 = pnand %p1125_p10, %p1124_p8 }
 0x334   : > { %802 = dma.done.wait (!%p675_p0), %s560_s8, 2048  }
 0x335   : > { %804 = vsyncadd (!%p675_p0), %s560_s8, 4294965248  ;;  %p18_p2 = scmp.ge.s32.totalorder %s885_s24, 4   ;;  %s1126_s18 = smov %s811_s19 }
 0x336   : > { %s1127_s19 = smov %s815_s20  ;;  %s1128_s20 = smov %s897_s27 }
 0x337   : > { %s1129_s21 = smov %s885_s24  ;;  %20 = sbr.rel (!%p18_p2) target bundleno = 5 (0x5), region = 85 }
 0x33e   :  { %565 = vsyncpa [#allocation3], 1 }
 0x33f   :  { %567 = vsyncpa [#allocation3 + $0x1], 1 }
 0x340   :  { %568 = vsyncpa [#allocation4], 1 }
 0x341   :  { %570 = vsyncpa [#allocation4 + $0x1], 1 }

</bundles_post_ra>
